<compile_context>
chip_gen: v6e
topology: v6e:2x2x1
jax: 0.10.0
libtpu: 0.0.40
codegen_flags: <defaults>
</compile_context>

<pallas_src>
import math

import jax
import jax.numpy as jnp
from jax.experimental import pallas as pl
from jax.experimental.pallas import tpu as pltpu


def _round_up(x, m):
    return ((x + m - 1) // m) * m


def _critic_kernel(x_ref, w1_ref, b1_ref, w2_ref, b2_ref, w3_ref, b3_ref, out_ref):
    """One batch tile, batch on the lane axis. All operands VMEM-resident.

    x_ref : (in_dim, TB)  packed [obs | act]^T for this tile
    w1_ref: (H1, in_dim)  (PyTorch linear_c1.weight layout)   b1_ref: (H1, 1)
    w2_ref: (H2, H1)      (PyTorch linear_c2.weight layout)   b2_ref: (H2, 1)
    w3_ref: (1, H2)       (PyTorch linear_c3.weight layout)   b3_ref: (1, 1) SMEM
    out_ref: (1, TB)      lane-dense value row for this tile
    """
    wdt = w1_ref.dtype

    # Layer 1: single fused-concat matmul, K = obs_dim + act_dim.
    h1 = (jnp.dot(w1_ref[...], x_ref[...], preferred_element_type=jnp.float32)
          + b1_ref[...])
    h1 = jnp.maximum(h1, 0.01 * h1)                       # LeakyReLU(0.01)

    # Layer 2.
    h2 = (jnp.dot(w2_ref[...], h1.astype(wdt), preferred_element_type=jnp.float32)
          + b2_ref[...])
    h2 = jnp.maximum(h2, 0.01 * h2)                       # LeakyReLU(0.01)

    # Layer 3: (1, H2) @ (H2, TB) -> (1, TB) lane-dense value row.
    v = jnp.dot(w3_ref[...], h2.astype(wdt), preferred_element_type=jnp.float32)
    out_ref[...] = (v + b3_ref[0, 0]).astype(out_ref.dtype)


def _choose_tile(B, block_b):
    """Batch tile (multiple of 128).  Large B keeps >= 2 grid steps (v7x TCs)."""
    if B <= 128:
        return 128
    half = _round_up((B + 1) // 2, 128)
    return max(128, min(block_b, half))


def openai_critic_forward(obs, act, params, *, block_b=2048,
                          compute_dtype=jnp.float32):
    """Critic forward.  obs:(B,obs_dim), act:(B,act_dim) -> value (B,1) f32."""
    B, obs_dim = obs.shape
    _, act_dim = act.shape
    in_dim = obs_dim + act_dim

    w1, b1 = params["w1"], params["b1"]          # (H1, in_dim), (H1, 1)
    w2, b2 = params["w2"], params["b2"]          # (H2, H1),    (H2, 1)
    w3, b3 = params["w3"], params["b3"]          # (1, H2),     (1, 1)
    H1, H2 = w1.shape[0], w2.shape[0]

    # Pack the concat once and put the batch on the lane axis: (in_dim, B).
    x_t = jnp.concatenate([obs, act], axis=1).T.astype(compute_dtype)

    tb = _choose_tile(B, block_b)
    b_pad = _round_up(B, tb)
    if b_pad != B:
        x_t = jnp.pad(x_t, ((0, 0), (0, b_pad - B)))      # garbage cols sliced off

    w1c = w1.astype(compute_dtype)
    w2c = w2.astype(compute_dtype)
    w3c = w3.astype(compute_dtype)

    grid = (b_pad // tb,)
    const = lambda i: (0, 0)   # weights/biases resident across all grid steps

    itemsize = jnp.dtype(compute_dtype).itemsize
    weight_bytes = (H1 * in_dim + H1 + H2 * H1 + H2 + H2 + 1) * 4
    cost = pl.CostEstimate(
        flops=2 * b_pad * (in_dim * H1 + H1 * H2 + H2),
        transcendentals=0,
        bytes_accessed=b_pad * in_dim * itemsize + b_pad * 4 + weight_bytes,
    )

    out_row = pl.pallas_call(
        _critic_kernel,
        out_shape=jax.ShapeDtypeStruct((1, b_pad), jnp.float32),
        grid_spec=pltpu.PrefetchScalarGridSpec(
            num_scalar_prefetch=0,
            grid=grid,
            in_specs=[
                pl.BlockSpec((in_dim, tb), lambda i: (0, i)),       # x^T tile
                pl.BlockSpec((H1, in_dim), const),                  # W1 (fused concat)
                pl.BlockSpec((H1, 1), const),                       # b1
                pl.BlockSpec((H2, H1), const),                      # W2
                pl.BlockSpec((H2, 1), const),                       # b2
                pl.BlockSpec((1, H2), const),                       # W3
                pl.BlockSpec(memory_space=pltpu.MemorySpace.SMEM),  # b3 scalar
            ],
            out_specs=pl.BlockSpec((1, tb), lambda i: (0, i)),      # lane-dense row
        ),
        compiler_params=pltpu.CompilerParams(
            dimension_semantics=("parallel",),   # independent batch tiles (v7x 2 TCs)
            vmem_limit_bytes=32 * 1024 * 1024,   # safe on v7x's 64 MiB physical VMEM
        ),
        cost_estimate=cost,
    )(x_t, w1c, b1, w2c, b2, w3c, b3)

    # (1, b_pad) lane-dense row -> (B, 1) column, dropping padded columns.
    return out_row[0, :B].reshape(B, 1).astype(jnp.float32)


def init_params(key, obs_dim, act_dim, h1, h2):
    """Mirror the PyTorch init: xavier_uniform (leaky_relu gain) on weights,
    PyTorch-default uniform(-1/sqrt(fan_in), 1/sqrt(fan_in)) on biases.
    Weights are stored in PyTorch's (out, in) layout, which is exactly what the
    batch-on-lanes kernel consumes (no transposes anywhere)."""
    in_dim = obs_dim + act_dim
    gain = math.sqrt(2.0 / (1.0 + 0.01 ** 2))  # nn.init.calculate_gain('leaky_relu')

    keys = jax.random.split(key, 6)

    def xavier(k, fan_in, fan_out):
        bound = gain * math.sqrt(6.0 / (fan_in + fan_out))
        return jax.random.uniform(k, (fan_out, fan_in), jnp.float32, -bound, bound)

    def bias(k, fan_in, fan_out):
        bound = 1.0 / math.sqrt(fan_in)
        return jax.random.uniform(k, (fan_out, 1), jnp.float32, -bound, bound)

    return {
        "w1": xavier(keys[0], in_dim, h1),   # (H1, in_dim)
        "b1": bias(keys[1], in_dim, h1),     # (H1, 1)
        "w2": xavier(keys[2], h1, h2),       # (H2, H1)
        "b2": bias(keys[3], h1, h2),         # (H2, 1)
        "w3": xavier(keys[4], h2, 1),        # (1, H2)
        "b3": bias(keys[5], h2, 1),          # (1, 1)
    }


def _reference_forward(obs, act, params):
    """Pure-JAX reference (standard row-major orientation) for correctness."""
    x = jnp.concatenate([obs, act], axis=1)
    h1 = x @ params["w1"].T + params["b1"].T
    h1 = jnp.where(h1 > 0, h1, 0.01 * h1)
    h2 = h1 @ params["w2"].T + params["b2"].T
    h2 = jnp.where(h2 > 0, h2, 0.01 * h2)
    return h2 @ params["w3"].T + params["b3"].T


if __name__ == "__main__":
    # Shapes consistent with the module: obs_shape_n=16, action_space_n=8,
    # num_hidden_1=32, num_hidden_2=32.
    OBS, ACT, H1, H2 = 16, 8, 32, 32

    key = jax.random.PRNGKey(0)
    k_obs, k_act, k_par, k_obs2, k_act2 = jax.random.split(key, 5)
    params = init_params(k_par, OBS, ACT, H1, H2)

    # Small-batch check (single 128-wide grid step).
    B = 8
    obs = jax.random.normal(k_obs, (B, OBS), jnp.float32)
    act = jax.random.normal(k_act, (B, ACT), jnp.float32)
    value = jax.block_until_ready(openai_critic_forward(obs, act, params))
    ref = _reference_forward(obs, act, params)
    assert value.shape == (B, 1)
    assert jnp.allclose(value, ref, atol=1e-4, rtol=1e-4)

    # Larger batch exercising the padded, 2-step (v7x-parallel) path.
    B2 = 1000
    obs2 = jax.random.normal(k_obs2, (B2, OBS), jnp.float32)
    act2 = jax.random.normal(k_act2, (B2, ACT), jnp.float32)
    value2 = jax.block_until_ready(openai_critic_forward(obs2, act2, params))
    ref2 = _reference_forward(obs2, act2, params)
    assert value2.shape == (B2, 1)
    assert jnp.allclose(value2, ref2, atol=1e-4, rtol=1e-4)

    # bf16-weight path (v5e/v6e lever): f32 accumulation, looser tolerance.
    value3 = jax.block_until_ready(
        openai_critic_forward(obs2, act2, params, compute_dtype=jnp.bfloat16))
    assert jnp.allclose(value3, ref2, atol=3e-2, rtol=3e-2)

    print("KERNEL_OK")
</pallas_src>

<mosaic_0001>
module attributes {stable_mosaic.version = 11 : i64} {
  func.func @_critic_kernel(%arg0: i32, %arg1: memref<24x128xf32, #tpu.memory_space<vmem>>, %arg2: memref<32x24xf32, #tpu.memory_space<vmem>>, %arg3: memref<32x1xf32, #tpu.memory_space<vmem>>, %arg4: memref<32x32xf32, #tpu.memory_space<vmem>>, %arg5: memref<32x1xf32, #tpu.memory_space<vmem>>, %arg6: memref<1x32xf32, #tpu.memory_space<vmem>>, %arg7: memref<1x1xf32, #tpu.memory_space<smem>>, %arg8: memref<1x128xf32, #tpu.memory_space<vmem>>) attributes {dimension_semantics = [#tpu.dimension_semantics<parallel>], iteration_bounds = array<i64: 1>, scalar_prefetch = 0 : i64, scratch_operands = 0 : i64, tpu.core_type = #tpu.core_type<tc>, window_params = [{transform_indices = @transform_0, window_bounds = array<i64: 24, 128>}, {pipeline_mode = #tpu.pipeline_mode<synchronous>, transform_indices = @transform_1, window_bounds = array<i64: 32, 24>}, {pipeline_mode = #tpu.pipeline_mode<synchronous>, transform_indices = @transform_2, window_bounds = array<i64: 32, 1>}, {pipeline_mode = #tpu.pipeline_mode<synchronous>, transform_indices = @transform_3, window_bounds = array<i64: 32, 32>}, {pipeline_mode = #tpu.pipeline_mode<synchronous>, transform_indices = @transform_4, window_bounds = array<i64: 32, 1>}, {pipeline_mode = #tpu.pipeline_mode<synchronous>, transform_indices = @transform_5, window_bounds = array<i64: 1, 32>}, {transform_indices = @transform_6, window_bounds = array<i64: 1, 1>}, {transform_indices = @transform_7, window_bounds = array<i64: 1, 128>}]} {
    %c0 = arith.constant 0 : index
    %c0_0 = arith.constant 0 : index
    %0 = vector.load %arg2[%c0, %c0_0] : memref<32x24xf32, #tpu.memory_space<vmem>>, vector<32x24xf32>
    %c0_1 = arith.constant 0 : index
    %c0_2 = arith.constant 0 : index
    %1 = vector.load %arg1[%c0_1, %c0_2] : memref<24x128xf32, #tpu.memory_space<vmem>>, vector<24x128xf32>
    %cst = arith.constant dense<0.000000e+00> : vector<32x128xf32>
    %2 = tpu.matmul %0, %1, %cst {dimension_numbers = #tpu.dot_dimension_numbers<[1], [0], [0], [1], [0, 0, 1, 1], [], []>} : vector<32x24xf32>, vector<24x128xf32>, vector<32x128xf32> -> vector<32x128xf32>
    %c0_3 = arith.constant 0 : index
    %c0_4 = arith.constant 0 : index
    %3 = vector.load %arg3[%c0_3, %c0_4] : memref<32x1xf32, #tpu.memory_space<vmem>>, vector<32x1xf32>
    %4 = vector.broadcast %3 : vector<32x1xf32> to vector<32x128xf32>
    %5 = arith.addf %2, %4 : vector<32x128xf32>
    %cst_5 = arith.constant 0.00999999977 : f32
    %6 = vector.broadcast %cst_5 : f32 to vector<32x128xf32>
    %7 = arith.mulf %6, %5 : vector<32x128xf32>
    %8 = arith.maximumf %5, %7 : vector<32x128xf32>
    %c0_6 = arith.constant 0 : index
    %c0_7 = arith.constant 0 : index
    %9 = vector.load %arg4[%c0_6, %c0_7] : memref<32x32xf32, #tpu.memory_space<vmem>>, vector<32x32xf32>
    %cst_8 = arith.constant dense<0.000000e+00> : vector<32x128xf32>
    %10 = tpu.matmul %9, %8, %cst_8 {dimension_numbers = #tpu.dot_dimension_numbers<[1], [0], [0], [1], [0, 0, 1, 1], [], []>} : vector<32x32xf32>, vector<32x128xf32>, vector<32x128xf32> -> vector<32x128xf32>
    %c0_9 = arith.constant 0 : index
    %c0_10 = arith.constant 0 : index
    %11 = vector.load %arg5[%c0_9, %c0_10] : memref<32x1xf32, #tpu.memory_space<vmem>>, vector<32x1xf32>
    %12 = vector.broadcast %11 : vector<32x1xf32> to vector<32x128xf32>
    %13 = arith.addf %10, %12 : vector<32x128xf32>
    %cst_11 = arith.constant 0.00999999977 : f32
    %14 = vector.broadcast %cst_11 : f32 to vector<32x128xf32>
    %15 = arith.mulf %14, %13 : vector<32x128xf32>
    %16 = arith.maximumf %13, %15 : vector<32x128xf32>
    %c0_12 = arith.constant 0 : index
    %c0_13 = arith.constant 0 : index
    %17 = vector.load %arg6[%c0_12, %c0_13] : memref<1x32xf32, #tpu.memory_space<vmem>>, vector<1x32xf32>
    %cst_14 = arith.constant dense<0.000000e+00> : vector<1x128xf32>
    %18 = tpu.matmul %17, %16, %cst_14 {dimension_numbers = #tpu.dot_dimension_numbers<[1], [0], [0], [1], [0, 0, 1, 1], [], []>} : vector<1x32xf32>, vector<32x128xf32>, vector<1x128xf32> -> vector<1x128xf32>
    %c0_15 = arith.constant 0 : index
    %c0_16 = arith.constant 0 : index
    %19 = memref.load %arg7[%c0_15, %c0_16] : memref<1x1xf32, #tpu.memory_space<smem>>
    %20 = vector.broadcast %19 : f32 to vector<1x128xf32>
    %21 = arith.addf %18, %20 : vector<1x128xf32>
    %c0_17 = arith.constant 0 : index
    %c0_18 = arith.constant 0 : index
    %22 = vector.load %arg8[%c0_17, %c0_18] : memref<1x128xf32, #tpu.memory_space<vmem>>, vector<1x128xf32>
    tpu.vector_store %arg8[%c0_17, %c0_18], %21 {strides = array<i32>} : memref<1x128xf32, #tpu.memory_space<vmem>>, vector<1x128xf32>,
    return
  }
  func.func @transform_0(%arg0: i32) -> (i32, i32) {
    %c0_i32 = arith.constant 0 : i32
    %c0_i32_0 = arith.constant 0 : i32
    return %c0_i32, %arg0 : i32, i32
  }
  func.func @transform_1(%arg0: i32) -> (i32, i32) {
    %c0_i32 = arith.constant 0 : i32
    %c0_i32_0 = arith.constant 0 : i32
    %c0_i32_1 = arith.constant 0 : i32
    return %c0_i32, %c0_i32_0 : i32, i32
  }
  func.func @transform_2(%arg0: i32) -> (i32, i32) {
    %c0_i32 = arith.constant 0 : i32
    %c0_i32_0 = arith.constant 0 : i32
    %c0_i32_1 = arith.constant 0 : i32
    return %c0_i32, %c0_i32_0 : i32, i32
  }
  func.func @transform_3(%arg0: i32) -> (i32, i32) {
    %c0_i32 = arith.constant 0 : i32
    %c0_i32_0 = arith.constant 0 : i32
    %c0_i32_1 = arith.constant 0 : i32
    return %c0_i32, %c0_i32_0 : i32, i32
  }
  func.func @transform_4(%arg0: i32) -> (i32, i32) {
    %c0_i32 = arith.constant 0 : i32
    %c0_i32_0 = arith.constant 0 : i32
    %c0_i32_1 = arith.constant 0 : i32
    return %c0_i32, %c0_i32_0 : i32, i32
  }
  func.func @transform_5(%arg0: i32) -> (i32, i32) {
    %c0_i32 = arith.constant 0 : i32
    %c0_i32_0 = arith.constant 0 : i32
    %c0_i32_1 = arith.constant 0 : i32
    return %c0_i32, %c0_i32_0 : i32, i32
  }
  func.func @transform_6(%arg0: i32) -> (i32, i32) {
    %c0_i32 = arith.constant 0 : i32
    %c0_i32_0 = arith.constant 0 : i32
    %c0_i32_1 = arith.constant 0 : i32
    return %c0_i32, %c0_i32_0 : i32, i32
  }
  func.func @transform_7(%arg0: i32) -> (i32, i32) {
    %c0_i32 = arith.constant 0 : i32
    %c0_i32_0 = arith.constant 0 : i32
    return %c0_i32, %arg0 : i32, i32
  }
}

</mosaic_0001>

<bundles_post_ra>
// kernel: tpu_custom_call.1
= control target key start
LH: loop header
LB: loop body
LE: loop exit
PB: predicated region body
PF: predicated region fallthrough
CT: control target
= control target key end

     0   :  { %vm59_vm0 = vcmask 195584   ;;  %v484_v3 = vmov 0   ;;  %s603_s0 = inlined_call_operand.vmem [shape: f32[24,128], index: 0, kind: input, shape index: {}]   ;;  %s604_s1 = inlined_call_operand.vmem [shape: f32[32,24], index: 1, kind: input, shape index: {}]   ;;  %s605_s2 = inlined_call_operand.vmem [shape: f32[32,1], index: 2, kind: input, shape index: {}]   ;;  %s606_s3 = inlined_call_operand.vmem [shape: f32[32,32], index: 3, kind: input, shape index: {}]   ;;  %s607_s4 = inlined_call_operand.vmem [shape: f32[32,1], index: 4, kind: input, shape index: {}]   ;;  %s608_s5 = inlined_call_operand.vmem [shape: f32[1,32], index: 5, kind: input, shape index: {}]   ;;  %s609_s6 = inlined_call_operand.<no memory space> [shape: f32[1,1], index: 6, kind: input, shape index: {}]   ;;  %s610_s7 = inlined_call_operand.hbm [shape: f32[1,128], index: 7, kind: output, shape index: {}]  }
   0x1   :  { %v34_v0 = vld [vmem:[%s603_s0 + $0x10] sm:$0xff]  ;;  %v33_v1 = vld [vmem:[%s603_s0 + $0x8] sm:$0xff]  ;;  %v28_v2 = vld [vmem:[%s604_s1] sm:$0xff]  ;;  %460 = vset.pattern.permute.xlu0 %v484_v3  ;;  %461 = vset.pattern.permute.xlu1 %v484_v3 }
   0x2   :  { %419 = vmatprep.subr.mxu0 %v34_v0  ;;  %v32_v4 = vld [vmem:[%s603_s0] sm:$0xff]  ;;  %425 = vmatprep.mubr.msk.f32.mxu0 %vm59_vm0, %v28_v2  ;;  %v38_v5 = vld [vmem:[%s605_s2 + $0x18] sm:$0xff]  ;;  %v36_v6 = vld [vmem:[%s605_s2 + $0x8] sm:$0xff] }
   0x3   :  { %420 = vmatpush3.msra.mxu0 %v34_v0  ;;  %56 = vperm.xlu0 %460, %v38_v5   ;;  %v29_v7 = vld [vmem:[%s604_s1 + $0x8] sm:$0xff]  ;;  %v37_v8 = vld [vmem:[%s605_s2 + $0x10] sm:$0xff] }
   0x4   :  { %421 = vmatprep.subr.mxu0 %v33_v1  ;;  %v30_v9 = vld [vmem:[%s604_s1 + $0x10] sm:$0xff]  ;;  %46 = vperm.xlu1 %461, %v36_v6  }
   0x5   :  { %422 = vmatpush3.msra.mxu0 %v33_v1 }
   0x6   :  { %423 = vmatprep.subr.mxu0 %v32_v4 }
   0x7   :  { %13 = vsyncpa [#allocation4], 0  ;;  %424 = vmatpush3.msra.mxu0 %v32_v4  ;;  %v35_v10 = vld [vmem:[%s605_s2] sm:$0xff]  ;;  %51 = vperm.xlu0 %460, %v37_v8   ;;  %v31_v11 = vld [vmem:[%s604_s1 + $0x18] sm:$0xff]  ;;  %vm193_vm1 = vcmask 261120   ;;  %v485_v40 = vmov 0.0   ;;  %v301_v62 = vstv %s609_s6 }
   0x8   :  { %426 = vmatmul.mubr.msk.f32.vlgmr.msra.gmra.mxu0 %vm59_vm0, %v29_v7  ;;  %v172_v12 = vld [vmem:[%s607_s4 + $0x18] sm:$0xff]  ;;  %41 = vperm.xlu1 %461, %v35_v10   ;;  %v171_v13 = vld [vmem:[%s607_s4 + $0x10] sm:$0xff]  ;;  %v170_v14 = vld [vmem:[%s607_s4 + $0x8] sm:$0xff]  ;;  %vm486_vm2 = vmmov 0   ;;  %s487_s15 = smov [#allocation3]  }
   0x9   :  { %428 = vmatprep.mubr.msk.f32.mxu0 %vm59_vm0, %v30_v9  ;;  %v169_v15 = vld [vmem:[%s607_s4] sm:$0xff]  ;;  %v166_v37 = vld [vmem:[%s606_s3 + $0x8] sm:$0xff]  ;;  %v167_v38 = vld [vmem:[%s606_s3 + $0x10] sm:$0xff]  ;;  %445 = vmatprep.subr.mxu0 %v485_v40  ;;  %s382_s0 = sshll.u32 %s487_s15, 4  ;;  %s383_s0 = int_to_ptr.vmem [resolvable:$true] %s382_s0 }
   0xa   :  { %v165_v16 = vld [vmem:[%s606_s3] sm:$0xff]  ;;  %v168_v39 = vld [vmem:[%s606_s3 + $0x18] sm:$0xff]  ;;  %s462_s16 = scalar_lea.vmem %s383_s0, 16  ;;  %s466_s17 = scalar_lea.vmem %s383_s0, 32 }
   0xb   :  { %190 = vperm.xlu0 %460, %v172_v12   ;;  %439 = vmatprep.mubr.msk.f32.mxu1 %vm193_vm1, %v165_v16  ;;  %v299_v61 = vld [vmem:[%s608_s5] sm:$0x1]  ;;  %p463_p0 = scmp.ne.s32.totalorder %s383_s0, %s462_s16  ;;  %p467_p1 = scmp.lt.s32.totalorder %s383_s0, %s383_s0 }
   0xc   :  { %429 = vmatmul.mubr.msk.f32.gmra.mxu0 %vm59_vm0, %v31_v11  ;;  %185 = vperm.xlu1 %461, %v171_v13   ;;  %p468_p2 = scmp.lt.s32.totalorder %s466_s17, %s462_s16 }
   0xd   :  { %453 = vmatprep.mubr.msk.f32.mxu0 %vm486_vm2, %v485_v40 }
   0xe   :  { %p469_p3 = por %p468_p2, %p467_p1 }
   0xf   :  { %180 = vperm.xlu0 %460, %v170_v14  }
  0x10   :  { %175 = vperm.xlu1 %461, %v169_v15   ;;  %p470_p4 = pnand %p469_p3, %p463_p0 }
  0x7e   :  { %v57_v17 = vpop.permute.xlu0 %56 }
  0x7f   :  { %v47_v18 = vpop.permute.xlu1 %46 }
  0x82   :  { %v52_v22 = vpop.permute.xlu0 %51 }
  0x83   :  { %v42_v25 = vpop.permute.xlu1 %41 }
  0x86   :  { %v191_v41 = vpop.permute.xlu0 %190 }
  0x87   :  { %v186_v42 = vpop.permute.xlu1 %185 }
  0x8a   :  { %v181_v45 = vpop.permute.xlu0 %180 }
  0x8b   :  { %v176_v49 = vpop.permute.xlu1 %175 }
  0xc8   :  { %v427_v19 = vpop.f32.mrf.mxu0 }
  0xc9   :  { %v144_v23 = vadd.f32 %v427_v19, %v47_v18 }
  0xca   :  { %v138_v20 = vpop.f32.mrf.mxu0 }
  0xcb   :  { %v139_v27 = vadd.f32 %v138_v20, %v42_v25  ;;  %v158_v30 = vmul.f32 0.01, %v144_v23 }
  0xcc   :  { %v430_v21 = vpop.f32.mrf.mxu0 }
  0xcd   :  { %v154_v24 = vadd.f32 %v430_v21, %v57_v17  ;;  %v157_v33 = vmul.f32 0.01, %v139_v27  ;;  %v162_v35 = vmax.f32 %v144_v23, %v158_v30 }
  0xce   :  { %v148_v26 = vpop.f32.mrf.mxu0 }
  0xcf   :  { %v160_v28 = vmul.f32 0.01, %v154_v24  ;;  %v149_v29 = vadd.f32 %v148_v26, %v52_v22  ;;  %v161_v36 = vmax.f32 %v139_v27, %v157_v33 }
  0xd1   :  { %v159_v31 = vmul.f32 0.01, %v149_v29  ;;  %v164_v32 = vmax.f32 %v154_v24, %v160_v28 }
  0xd3   :  { %v163_v34 = vmax.f32 %v149_v29, %v159_v31  ;;  %431 = vmatprep.subr.mxu1 %v164_v32 }
  0xd4   :  { %432 = vmatpush3.msra.mxu1 %v164_v32 }
  0xd5   :  { %433 = vmatprep.subr.mxu1 %v163_v34 }
  0xd6   :  { %434 = vmatpush3.msra.mxu1 %v163_v34 }
  0xd7   :  { %435 = vmatprep.subr.mxu1 %v162_v35 }
  0xd8   :  { %436 = vmatpush3.msra.mxu1 %v162_v35 }
  0xd9   :  { %437 = vmatprep.subr.mxu1 %v161_v36 }
  0xda   :  { %438 = vmatpush3.msra.mxu1 %v161_v36 }
  0xdb   :  { %440 = vmatmul.mubr.msk.f32.vlgmr.msra.gmra.mxu1 %vm193_vm1, %v166_v37 }
  0xdc   :  { %442 = vmatprep.mubr.msk.f32.mxu1 %vm193_vm1, %v167_v38 }
  0xdf   :  { %443 = vmatmul.mubr.msk.f32.gmra.mxu1 %vm193_vm1, %v168_v39 }
 0x19b   :  { %v441_v43 = vpop.f32.mrf.mxu1 }
 0x19c   :  { %v278_v47 = vadd.f32 %v441_v43, %v181_v45 }
 0x19d   :  { %v272_v44 = vpop.f32.mrf.mxu1 }
 0x19e   :  { %v273_v51 = vadd.f32 %v272_v44, %v176_v49  ;;  %v292_v54 = vmul.f32 0.01, %v278_v47 }
 0x19f   :  { %v444_v46 = vpop.f32.mrf.mxu1 }
 0x1a0   :  { %v288_v48 = vadd.f32 %v444_v46, %v191_v41  ;;  %v291_v57 = vmul.f32 0.01, %v273_v51  ;;  %v296_v59 = vmax.f32 %v278_v47, %v292_v54 }
 0x1a1   :  { %v282_v50 = vpop.f32.mrf.mxu1 }
 0x1a2   :  { %v294_v52 = vmul.f32 0.01, %v288_v48  ;;  %v283_v53 = vadd.f32 %v282_v50, %v186_v42  ;;  %v295_v60 = vmax.f32 %v273_v51, %v291_v57 }
 0x1a4   :  { %v298_v55 = vmax.f32 %v288_v48, %v294_v52  ;;  %v293_v56 = vmul.f32 0.01, %v283_v53 }
 0x1a6   :  { %v297_v58 = vmax.f32 %v283_v53, %v293_v56  ;;  %446 = vmatpush3.msra.mxu0 %v298_v55 }
 0x1a7   :  { %447 = vmatprep.subr.mxu0 %v485_v40 }
 0x1a8   :  { %448 = vmatpush3.msra.mxu0 %v297_v58 }
 0x1a9   :  { %449 = vmatprep.subr.mxu0 %v485_v40 }
 0x1aa   :  { %450 = vmatpush3.msra.mxu0 %v296_v59 }
 0x1ab   :  { %451 = vmatprep.subr.mxu0 %v485_v40 }
 0x1ac   :  { %452 = vmatpush3.msra.mxu0 %v295_v60 }
 0x1ad   :  { %454 = vmatmul.mubr.msk.f32.vlgmr.msra.gmra.mxu0 %vm193_vm1, %v299_v61 }
 0x26d   :  { %v371_v63 = vpop.f32.mrf.mxu0 }
 0x26e   :  { %v372_v0 = vadd.f32 %v371_v63, %v301_v62 }
 0x26f   :  { %v455_v1 = vpop.f32.mrf.mxu0 }
 0x270   :  { %375 = vst [vmem:[#allocation3] sm:$0x1] %v372_v0 }
 0x271   :  { %473 = shalt.err (!%p470_p4)
}
 0x272   :  { %385 = dma.vmem_to_hbm [thread:$0]  %s383_s0, 16, %s610_s7, [#allocation4]  }
 0x273   :  { %482 = dma.done.wait [#allocation4], 16  }
 0x274   :  { %483 = vsyncadd [#allocation4], 4294967280 }
 0x275   :  { %389 = vsyncpa [#allocation4], 1 }

</bundles_post_ra>
